<compile_context>
chip_gen: v5e
topology: v5e:2x2
jax: 0.10.0
libtpu: 0.0.40
codegen_flags: <defaults>
</compile_context>

<pallas_src>
import functools

import jax
import jax.numpy as jnp
from jax import lax
from jax.experimental import pallas as pl
from jax.experimental.pallas import tpu as pltpu

NEG_SLOPE = 0.01   # nn.LeakyReLU() default
BN_EPS = 1e-5      # nn.BatchNorm2d default
LANE = 128


def _round_up(x, m):
    return (x + m - 1) // m * m


def _vmem_limit_bytes():
    # ~80% of physical VMEM: leaves compiler headroom on v7x (64 MiB) while using most of
    # the 128 MiB on v5e/v6e.
    try:
        cap = pltpu.get_tpu_info().vmem_capacity_bytes
    except Exception:
        cap = 64 * 1024 * 1024
    return int(cap * 0.8)


def _pick_tr(hout, wgp, kin, conv_lanes, out_lanes, out_itemsize,
             target_m=1024, budget=24 * 1024 * 1024):
    """Pooled rows per band: M = 2*TR*WGp near target_m, under a VMEM budget."""
    divisors = [t for t in range(1, hout + 1) if hout % t == 0]

    def vmem(tr):
        m = 2 * tr * wgp
        return (2 * (2 * tr + 2) * wgp * kin * 2          # double-buffered bf16 input band
                + 2 * tr * wgp * out_lanes * out_itemsize  # double-buffered output band
                + 6 * m * conv_lanes * 4)                  # f32 value intermediates

    fitting = [t for t in divisors if vmem(t) <= budget]
    cands = fitting if fitting else [min(divisors, key=vmem)]
    return min(cands, key=lambda t: abs(2 * t * wgp - target_m))


def _encoder_block_kernel(xq_ref, w_ref, shift_ref, o_ref, *, TR, WGP, GPCH):
    """One grid step: one batch element, one band of TR pooled output rows.

    xq_ref   : (1, 1, (2*TR+2)*WGP, KIN) bf16  group-packed, zero-padded input band
    w_ref    : (3, KIN, 2*GPCH)          bf16  BN-folded weights, lanes = (p, q, cout)
    shift_ref: (1, 2*GPCH)               f32   folded conv-bias / BN shift
    o_ref    : (1, TR, WGP, GPCH)              pooled output band, lanes = (q, cout)
    """
    M = 2 * TR * WGP   # rows = (conv row within band, column group)

    # Convolution: 3 bf16 MXU matmuls (one per kernel row), f32 accumulation.
    # Keep the chained accumulate so v7x's MRB accumulates in place.
    acc = jnp.zeros((M, 2 * GPCH), jnp.float32)
    for kh in range(3):
        patches = xq_ref[0, 0, pl.ds(kh * WGP, M), :]            # (M, KIN), bf16, aligned
        acc = acc + jnp.dot(patches, w_ref[kh],
                            preferred_element_type=jnp.float32)

    y = acc + shift_ref[...]                                     # conv bias + BN
    y = jnp.where(y > 0, y, NEG_SLOPE * y)                       # LeakyReLU

    # MaxPool2d(2): the two conv-column parities (p) of every pooled column sit in the two
    # 128-aligned lane halves; height pairs are adjacent WGP-row groups. VPU max only,
    # single lane-dense band store.
    wmax = jnp.maximum(y[:, :GPCH], y[:, GPCH:])                 # (M, GPCH), lanes (q, cout)
    wp = wmax.reshape(TR, 2, WGP, GPCH)                          # WGP % 8 == 0 -> tile aligned
    o_ref[0] = jnp.maximum(wp[:, 0], wp[:, 1]).astype(o_ref.dtype)


def encoder_block(x_nchw, w_oihw, bias, gamma, beta, run_mean, run_var,
                  *, out_dtype=jnp.bfloat16, nchw_output=True):
    N, CIN, H, W = x_nchw.shape
    COUT = w_oihw.shape[0]
    assert H % 2 == 0 and W % 2 == 0
    Hout, Wout = H // 2, W // 2

    # Lane packing: G conv-output columns per lane group, lanes ordered [p, q, cout]
    # (p = column parity inside a width pool, q = pooled column inside the group).
    if COUT <= 64 and W % 4 == 0:
        G, CH = 4, 64                          # small COUT: 2 pooled cols / 128-lane group
    else:
        G, CH = 2, _round_up(COUT, LANE)       # large COUT: classic column-pair packing
    GP = G // 2                                # pooled columns per group
    GPCH = GP * CH                             # pooled lane width (multiple of 128)
    KIN = (G + 2) * CIN                        # im2col K per kernel row
    WG = W // G                                # valid column groups per row
    WGp = _round_up(WG, 8)                     # sublane-aligned group count

    TR = _pick_tr(Hout, WGp, KIN, 2 * GPCH, GPCH, jnp.dtype(out_dtype).itemsize)
    n_bands = Hout // TR

    # ---- glue (plain JAX, fuses under jit): layout, pad, group packing, banding ----
    x = jnp.transpose(x_nchw, (0, 2, 3, 1)).astype(jnp.bfloat16)        # NHWC, bf16 early
    wpad_total = G * WGp + 2
    xpad = jnp.pad(x, ((0, 0), (1, 1), (1, wpad_total - (W + 1)), (0, 0)))
    # xrows[n, r, jj, dw*CIN + c] = xpad[n, r, G*jj + dw, c],  dw in 0..G+1
    cols = [xpad[:, :, dw:dw + G * (WGp - 1) + 1:G, :] for dw in range(G + 2)]
    xrows = jnp.concatenate(cols, axis=-1)                              # (N, H+2, WGp, KIN)
    # Duplicate the 2-conv-row halo per band so each grid step DMAs only its own band.
    r_idx = 2 * TR * jnp.arange(n_bands)[:, None] + jnp.arange(2 * TR + 2)[None, :]
    xq = jnp.take(xrows, r_idx, axis=1)                                 # (N, nb, 2TR+2, WGp, KIN)
    xq = xq.reshape(N, n_bands, (2 * TR + 2) * WGp, KIN)

    # Fold conv bias + BatchNorm (inference mode, running stats) into weights + one shift.
    scale = gamma / jnp.sqrt(run_var + BN_EPS)                          # (COUT,)
    shift = (bias - run_mean) * scale + beta                            # (COUT,)
    w_hwio = jnp.transpose(w_oihw, (2, 3, 1, 0)) * scale[None, None, None, :]
    # w2[kh, dw*CIN + c, p*GP*CH + q*CH + o] = w_hwio[kh, kw, c, o] with dw = 2q + p + kw
    w2 = jnp.zeros((3, G + 2, CIN, 2, GP, CH), jnp.float32)
    for p in range(2):
        for q in range(GP):
            for kw in range(3):
                w2 = w2.at[:, 2 * q + p + kw, :, p, q, :COUT].set(w_hwio[:, kw, :, :])
    w2 = w2.reshape(3, KIN, 2 * GPCH).astype(jnp.bfloat16)
    shift2 = jnp.zeros((2, GP, CH), jnp.float32).at[:, :, :COUT].set(shift)
    shift2 = shift2.reshape(1, 2 * GPCH)

    kernel = functools.partial(_encoder_block_kernel, TR=TR, WGP=WGp, GPCH=GPCH)

    # TODO(synk): for very small CIN on v6e, folding kh into K (one K=3*(G+2)*CIN matmul)
    # would fill the MXU better at the cost of ~3x input duplication; not done here.
    out_packed = pl.pallas_call(
        kernel,
        out_shape=jax.ShapeDtypeStruct((N, Hout, WGp, GPCH), out_dtype),
        grid=(N, n_bands),
        in_specs=[
            pl.BlockSpec((1, 1, (2 * TR + 2) * WGp, KIN), lambda n, b: (n, b, 0, 0)),
            pl.BlockSpec((3, KIN, 2 * GPCH), lambda n, b: (0, 0, 0)),
            pl.BlockSpec((1, 2 * GPCH), lambda n, b: (0, 0)),
        ],
        out_specs=pl.BlockSpec((1, TR, WGp, GPCH), lambda n, b: (n, b, 0, 0)),
        compiler_params=pltpu.CompilerParams(
            dimension_semantics=("parallel", "parallel"),
            vmem_limit_bytes=_vmem_limit_bytes()),
    )(xq, w2, shift2)

    # Unpack lanes (q, cout) -> channels; drop width-group / channel padding.
    out = out_packed.reshape(N, Hout, WGp, GP, CH)[..., :COUT]
    out = out.reshape(N, Hout, WGp * GP, COUT)[:, :, :Wout, :]          # NHWC
    if nchw_output:
        out = jnp.transpose(out, (0, 3, 1, 2))                          # NCHW (extra HBM pass)
    return out


def reference(x_nchw, w_oihw, bias, gamma, beta, run_mean, run_var):
    """Pure-JAX f32 reference matching the PyTorch module (BN in eval mode)."""
    y = lax.conv_general_dilated(
        x_nchw, w_oihw, window_strides=(1, 1), padding=((1, 1), (1, 1)),
        dimension_numbers=("NCHW", "OIHW", "NCHW"),
        precision=lax.Precision.HIGHEST)
    y = y + bias[None, :, None, None]
    y = (y - run_mean[None, :, None, None]) / jnp.sqrt(
        run_var[None, :, None, None] + BN_EPS)
    y = y * gamma[None, :, None, None] + beta[None, :, None, None]
    y = jnp.where(y > 0, y, NEG_SLOPE * y)
    y = lax.reduce_window(y, -jnp.inf, lax.max,
                          (1, 1, 2, 2), (1, 1, 2, 2), "VALID")
    return y


# TODO(synk): BatchNorm is implemented in inference mode (running statistics);
# training-mode batch-statistic reduction is not implemented.

if __name__ == "__main__":
    key = jax.random.PRNGKey(0)
    k_x, k_w, k_b, k_g, k_be, k_m, k_v = jax.random.split(key, 7)

    N, CIN, COUT, H, W = 2, 4, 8, 16, 16

    x = jax.random.normal(k_x, (N, CIN, H, W), jnp.float32)
    w = 0.1 * jax.random.normal(k_w, (COUT, CIN, 3, 3), jnp.float32)
    bias = 0.1 * jax.random.normal(k_b, (COUT,), jnp.float32)
    gamma = 1.0 + 0.1 * jax.random.normal(k_g, (COUT,), jnp.float32)
    beta = 0.1 * jax.random.normal(k_be, (COUT,), jnp.float32)
    run_mean = 0.1 * jax.random.normal(k_m, (COUT,), jnp.float32)
    run_var = 0.5 + jnp.abs(jax.random.normal(k_v, (COUT,), jnp.float32)) * 0.5

    out = jax.jit(encoder_block)(x, w, bias, gamma, beta, run_mean, run_var)
    out = jax.block_until_ready(out)

    ref = jax.block_until_ready(reference(x, w, bias, gamma, beta, run_mean, run_var))

    assert out.shape == (N, COUT, H // 2, W // 2), out.shape
    # bf16 MXU inputs (f32 accumulation) + bf16 output vs. the f32 HIGHEST reference.
    out_f32 = out.astype(jnp.float32)
    assert jnp.allclose(out_f32, ref, atol=3e-2, rtol=3e-2), (
        float(jnp.max(jnp.abs(out_f32 - ref))))

    print("KERNEL_OK")
</pallas_src>

<mosaic_0001>
module attributes {stable_mosaic.version = 11 : i64} {
  func.func @_encoder_block_kernel(%arg0: i32, %arg1: i32, %arg2: memref<1x1x144x24xbf16, #tpu.memory_space<vmem>>, %arg3: memref<3x24x256xbf16, #tpu.memory_space<vmem>>, %arg4: memref<1x256xf32, #tpu.memory_space<vmem>>, %arg5: memref<1x8x8x128xbf16, #tpu.memory_space<vmem>>) attributes {dimension_semantics = [#tpu.dimension_semantics<parallel>, #tpu.dimension_semantics<parallel>], iteration_bounds = array<i64: 2, 1>, scalar_prefetch = 0 : i64, scratch_operands = 0 : i64, tpu.core_type = #tpu.core_type<tc>, window_params = [{transform_indices = @transform_0, window_bounds = array<i64: 1, 1, 144, 24>}, {pipeline_mode = #tpu.pipeline_mode<synchronous>, transform_indices = @transform_1, window_bounds = array<i64: 3, 24, 256>}, {pipeline_mode = #tpu.pipeline_mode<synchronous>, transform_indices = @transform_2, window_bounds = array<i64: 1, 256>}, {transform_indices = @transform_3, window_bounds = array<i64: 1, 8, 8, 128>}]} {
    %cst = arith.constant 0.000000e+00 : f32
    %0 = vector.broadcast %cst : f32 to vector<128x256xf32>
    %c0 = arith.constant 0 : index
    %c0_0 = arith.constant 0 : index
    %c0_1 = arith.constant 0 : index
    %c0_2 = arith.constant 0 : index
    %1 = vector.load %arg2[%c0, %c0_0, %c0_1, %c0_2] : memref<1x1x144x24xbf16, #tpu.memory_space<vmem>>, vector<1x1x128x24xbf16>
    %2 = vector.shape_cast %1 : vector<1x1x128x24xbf16> to vector<128x24xbf16>
    %c0_3 = arith.constant 0 : index
    %c0_4 = arith.constant 0 : index
    %c0_5 = arith.constant 0 : index
    %3 = vector.load %arg3[%c0_3, %c0_4, %c0_5] : memref<3x24x256xbf16, #tpu.memory_space<vmem>>, vector<1x24x256xbf16>
    %4 = vector.shape_cast %3 : vector<1x24x256xbf16> to vector<24x256xbf16>
    %cst_6 = arith.constant dense<0.000000e+00> : vector<128x256xf32>
    %5 = tpu.matmul %2, %4, %cst_6 {dimension_numbers = #tpu.dot_dimension_numbers<[1], [0], [0], [1], [0, 0, 1, 1], [], []>} : vector<128x24xbf16>, vector<24x256xbf16>, vector<128x256xf32> -> vector<128x256xf32>
    %6 = arith.addf %0, %5 : vector<128x256xf32>
    %c0_7 = arith.constant 0 : index
    %c0_8 = arith.constant 0 : index
    %c8 = arith.constant 8 : index
    %c0_9 = arith.constant 0 : index
    %7 = vector.load %arg2[%c0_7, %c0_8, %c8, %c0_9] : memref<1x1x144x24xbf16, #tpu.memory_space<vmem>>, vector<1x1x128x24xbf16>
    %8 = vector.shape_cast %7 : vector<1x1x128x24xbf16> to vector<128x24xbf16>
    %c1 = arith.constant 1 : index
    %c0_10 = arith.constant 0 : index
    %c0_11 = arith.constant 0 : index
    %9 = vector.load %arg3[%c1, %c0_10, %c0_11] : memref<3x24x256xbf16, #tpu.memory_space<vmem>>, vector<1x24x256xbf16>
    %10 = vector.shape_cast %9 : vector<1x24x256xbf16> to vector<24x256xbf16>
    %cst_12 = arith.constant dense<0.000000e+00> : vector<128x256xf32>
    %11 = tpu.matmul %8, %10, %cst_12 {dimension_numbers = #tpu.dot_dimension_numbers<[1], [0], [0], [1], [0, 0, 1, 1], [], []>} : vector<128x24xbf16>, vector<24x256xbf16>, vector<128x256xf32> -> vector<128x256xf32>
    %12 = arith.addf %6, %11 : vector<128x256xf32>
    %c0_13 = arith.constant 0 : index
    %c0_14 = arith.constant 0 : index
    %c16 = arith.constant 16 : index
    %c0_15 = arith.constant 0 : index
    %13 = vector.load %arg2[%c0_13, %c0_14, %c16, %c0_15] : memref<1x1x144x24xbf16, #tpu.memory_space<vmem>>, vector<1x1x128x24xbf16>
    %14 = vector.shape_cast %13 : vector<1x1x128x24xbf16> to vector<128x24xbf16>
    %c2 = arith.constant 2 : index
    %c0_16 = arith.constant 0 : index
    %c0_17 = arith.constant 0 : index
    %15 = vector.load %arg3[%c2, %c0_16, %c0_17] : memref<3x24x256xbf16, #tpu.memory_space<vmem>>, vector<1x24x256xbf16>
    %16 = vector.shape_cast %15 : vector<1x24x256xbf16> to vector<24x256xbf16>
    %cst_18 = arith.constant dense<0.000000e+00> : vector<128x256xf32>
    %17 = tpu.matmul %14, %16, %cst_18 {dimension_numbers = #tpu.dot_dimension_numbers<[1], [0], [0], [1], [0, 0, 1, 1], [], []>} : vector<128x24xbf16>, vector<24x256xbf16>, vector<128x256xf32> -> vector<128x256xf32>
    %18 = arith.addf %12, %17 : vector<128x256xf32>
    %c0_19 = arith.constant 0 : index
    %c0_20 = arith.constant 0 : index
    %19 = vector.load %arg4[%c0_19, %c0_20] : memref<1x256xf32, #tpu.memory_space<vmem>>, vector<1x256xf32>
    %20 = vector.broadcast %19 : vector<1x256xf32> to vector<128x256xf32>
    %21 = arith.addf %18, %20 : vector<128x256xf32>
    %cst_21 = arith.constant 0.000000e+00 : f32
    %22 = vector.broadcast %cst_21 : f32 to vector<128x256xf32>
    %23 = arith.cmpf ogt, %21, %22 : vector<128x256xf32>
    %cst_22 = arith.constant 0.00999999977 : f32
    %24 = vector.broadcast %cst_22 : f32 to vector<128x256xf32>
    %25 = arith.mulf %24, %21 : vector<128x256xf32>
    %26 = arith.select %23, %21, %25 : vector<128x256xi1>, vector<128x256xf32>
    %27 = vector.extract_strided_slice %26 {offsets = [0, 0], sizes = [128, 128], strides = [1, 1]} : vector<128x256xf32> to vector<128x128xf32>
    %28 = vector.extract_strided_slice %26 {offsets = [0, 128], sizes = [128, 128], strides = [1, 1]} : vector<128x256xf32> to vector<128x128xf32>
    %29 = arith.maximumf %27, %28 : vector<128x128xf32>
    %30 = vector.shape_cast %29 : vector<128x128xf32> to vector<8x2x8x128xf32>
    %31 = vector.extract_strided_slice %30 {offsets = [0, 0, 0, 0], sizes = [8, 1, 8, 128], strides = [1, 1, 1, 1]} : vector<8x2x8x128xf32> to vector<8x1x8x128xf32>
    %32 = vector.shape_cast %31 : vector<8x1x8x128xf32> to vector<8x8x128xf32>
    %33 = vector.extract_strided_slice %30 {offsets = [0, 1, 0, 0], sizes = [8, 1, 8, 128], strides = [1, 1, 1, 1]} : vector<8x2x8x128xf32> to vector<8x1x8x128xf32>
    %34 = vector.shape_cast %33 : vector<8x1x8x128xf32> to vector<8x8x128xf32>
    %35 = arith.maximumf %32, %34 : vector<8x8x128xf32>
    %36 = arith.truncf %35 : vector<8x8x128xf32> to vector<8x8x128xbf16>
    %c0_23 = arith.constant 0 : index
    %c0_24 = arith.constant 0 : index
    %c0_25 = arith.constant 0 : index
    %c0_26 = arith.constant 0 : index
    %37 = vector.load %arg5[%c0_23, %c0_24, %c0_25, %c0_26] : memref<1x8x8x128xbf16, #tpu.memory_space<vmem>>, vector<1x8x8x128xbf16>
    %38 = vector.shape_cast %37 : vector<1x8x8x128xbf16> to vector<8x8x128xbf16>
    %39 = vector.shape_cast %36 : vector<8x8x128xbf16> to vector<1x8x8x128xbf16>
    tpu.vector_store %arg5[%c0_23, %c0_24, %c0_25, %c0_26], %39 {strides = array<i32>} : memref<1x8x8x128xbf16, #tpu.memory_space<vmem>>, vector<1x8x8x128xbf16>,
    return
  }
  func.func @transform_0(%arg0: i32, %arg1: i32) -> (i32, i32, i32, i32) {
    %c0_i32 = arith.constant 0 : i32
    %c0_i32_0 = arith.constant 0 : i32
    %c0_i32_1 = arith.constant 0 : i32
    return %arg0, %arg1, %c0_i32, %c0_i32_0 : i32, i32, i32, i32
  }
  func.func @transform_1(%arg0: i32, %arg1: i32) -> (i32, i32, i32) {
    %c0_i32 = arith.constant 0 : i32
    %c0_i32_0 = arith.constant 0 : i32
    %c0_i32_1 = arith.constant 0 : i32
    %c0_i32_2 = arith.constant 0 : i32
    return %c0_i32, %c0_i32_0, %c0_i32_1 : i32, i32, i32
  }
  func.func @transform_2(%arg0: i32, %arg1: i32) -> (i32, i32) {
    %c0_i32 = arith.constant 0 : i32
    %c0_i32_0 = arith.constant 0 : i32
    %c0_i32_1 = arith.constant 0 : i32
    return %c0_i32, %c0_i32_0 : i32, i32
  }
  func.func @transform_3(%arg0: i32, %arg1: i32) -> (i32, i32, i32, i32) {
    %c0_i32 = arith.constant 0 : i32
    %c0_i32_0 = arith.constant 0 : i32
    %c0_i32_1 = arith.constant 0 : i32
    return %arg0, %arg1, %c0_i32, %c0_i32_0 : i32, i32, i32, i32
  }
}

</mosaic_0001>

<bundles_post_ra>
// kernel: encoder_block.1
= control target key start
LH: loop header
LB: loop body
LE: loop exit
PB: predicated region body
PF: predicated region fallthrough
CT: control target
= control target key end

     0   :  { %s1396_s12 = smov 0   ;;  %s1398_s13 = smov 0   ;;  %s1695_s0 = inlined_call_operand.vmem [shape: bf16[2,1,144,24], index: 0, kind: input, shape index: {}]   ;;  %s1696_s1 = inlined_call_operand.vmem [shape: bf16[3,24,256], index: 1, kind: input, shape index: {}]   ;;  %s1697_s2 = inlined_call_operand.vmem [shape: f32[1,256], index: 2, kind: input, shape index: {}]   ;;  %s1698_s3 = inlined_call_operand.vmem [shape: bf16[2,8,8,128], index: 3, kind: output, shape index: {}]  }
   0x1   :  { %s1400_s14 = smov 0  }
   0x2 LB: > { %s25_s15 = sadd.s32 1, %s1370_s13  ;;  %p1074_p0 = scmp.ge.s32.totalorder %s1374_s14, 1  ;;  %s1374_s14 = sphi %s1400_s14, %s13_s14   ;;  %s1370_s13 = sphi %s1398_s13, %s1700_s13   ;;  %s1366_s12 = sphi %s1396_s12, %s1699_s12  }
   0x3   : > { %p27_p1 = scmp.ge.s32.totalorder %s25_s15, 2  ;;  %p157_p2 = scmp.lt.s32.totalorder %s1374_s14, 3 }
   0x5   : > { %s1702_s15 = smov (%p27_p1, %s25_s15), 0  ;;  %p158_p3 = pnand %p1074_p0, %p157_p2 }
   0x6   : > { %p189_p4 = scmp.lt.s32.totalorder (!%p158_p3), %s1366_s12, 1 }
   0x7   : > { %161 = sbr.rel (%p158_p3) target bundleno = 360 (0x168), region = 32 }
   0xc   : > { %v1080_v0 = vld [vmem:[%s1696_s1 + $0x28] sm:$0xff]  ;;  %vm313_vm0 = vcmask 1043456   ;;  %v227_v3 = vld [vmem:[%s1696_s1 + $0x10] sm:$0xff]  ;;  %v1131_v4 = vld [vmem:[%s1696_s1 + $0x40] sm:$0xff]  ;;  %s1704_s12 = smov (!%p189_p4, %s1366_s12), 1  ;;  %vm288_vm1 = vcmask 195584  }
   0xd   : > { %v280_v1 = vunpack.c.l.b16 %v1080_v0  ;;  %v281_v2 = vunpack.c.h.b16 %v1080_v0  ;;  %v1083_v7 = vld [vmem:[%s1696_s1 + $0x18] sm:$0xf]  ;;  %v1194_v8 = vld [vmem:[%s1696_s1 + $0x1c] sm:$0xf0]  ;;  %v435_v9 = vunpack.c.l.b16 %v227_v3  ;;  %v436_v10 = vunpack.c.h.b16 %v227_v3  ;;  %v1193_v11 = vld [vmem:[%s1696_s1 + $0x1c] sm:$0xf] }
   0xe   : > { %v1085_v12 = vld [vmem:[%s1696_s1 + $0x20] sm:$0xf0]  ;;  %v638_v13 = vunpack.c.l.b16 %v1131_v4  ;;  %v639_v14 = vunpack.c.h.b16 %v1131_v4  ;;  %s1327_s30 = smul.u32 72, %s1704_s12  ;;  %v1084_v19 = vor.u32 %v1194_v8, %v1083_v7  ;;  %v1107_v29 = vld [vmem:[%s1696_s1] sm:$0xf]  ;;  %s1190_s29 = sshll.u32 %s1704_s12, 5 }
   0xf   : > { %v284_v5 = vpack.c.b16 %v280_v1, %v280_v1  ;;  %v285_v6 = vpack.c.b16 %v281_v2, %v281_v2  ;;  %v439_v17 = vpack.c.b16 %v435_v9, %v435_v9  ;;  %v440_v18 = vpack.c.b16 %v436_v10, %v436_v10  ;;  %v1192_v30 = vld [vmem:[%s1696_s1 + $0x4] sm:$0xf0]  ;;  %v1191_v31 = vld [vmem:[%s1696_s1 + $0x4] sm:$0xf]  ;;  %v1109_v33 = vld [vmem:[%s1696_s1 + $0x8] sm:$0xf0]  ;;  %s1633_s5 = scalar_lea.vmem %s1698_s3, %s1190_s29 }
  0x10   : > { %v1088_v20 = vor.u32 %v1193_v11, %v1085_v12  ;;  %s1443_s6 = scalar_lea.vmem %s1695_s0, %s1327_s30  ;;  %v642_v21 = vpack.c.b16 %v638_v13, %v638_v13  ;;  %v643_v22 = vpack.c.b16 %v639_v14, %v639_v14  ;;  %v1108_v32 = vor.u32 %v1192_v30, %v1107_v29  ;;  %v1166_v34 = vld [vmem:[%s1696_s1 + $0x30] sm:$0xf]  ;;  %v1204_v35 = vld [vmem:[%s1696_s1 + $0x34] sm:$0xf0]  ;;  %v1203_v38 = vld [vmem:[%s1696_s1 + $0x34] sm:$0xf] }
  0x11   : > { %v315_v15 = vsel %vm313_vm0, %v284_v5, 0  ;;  %v318_v16 = vsel %vm313_vm0, %v285_v6, 0  ;;  %v1313_v23 = vld [vmem:[%s1443_s6 + $0x4] sm:$0xff]   ;;  %v468_v25 = vsel %vm313_vm0, %v439_v17, 0  ;;  %v471_v26 = vsel %vm313_vm0, %v440_v18, 0  ;;  %v1315_v41 = vld [vmem:[%s1443_s6 + $0xc] sm:$0xff]  }
  0x12   : > { %326 = vmatpush.bf16.msra.mxu0 %v315_v15  ;;  %1307 = vmatpush.bf16.msra.mxu2 %v315_v15  ;;  %v1321_v24 = vld [vmem:[%s1443_s6 + $0x24] sm:$0xff]   ;;  %v671_v27 = vsel %vm313_vm0, %v642_v21, 0  ;;  %v674_v28 = vsel %vm313_vm0, %v643_v22, 0  ;;  %v1112_v36 = vor.u32 %v1191_v31, %v1109_v33  ;;  %v1167_v37 = vor.u32 %v1204_v35, %v1166_v34  ;;  %v1168_v39 = vld [vmem:[%s1696_s1 + $0x38] sm:$0xf0]  ;;  %v1323_v42 = vld [vmem:[%s1443_s6 + $0x2c] sm:$0xff]  }
  0x13   : > { %375 = vmatpush.bf16.msra.mxu1 %v318_v16  ;;  %1309 = vmatpush.bf16.msra.mxu3 %v318_v16  ;;  %v1171_v40 = vor.u32 %v1203_v38, %v1168_v39  ;;  %v1317_v43 = vld [vmem:[%s1443_s6 + $0x14] sm:$0xff]   ;;  %v1319_v45 = vld [vmem:[%s1443_s6 + $0x1c] sm:$0xff]   ;;  %v1195_v47 = vld [vmem:[%s1443_s6 + $0x8] sm:$0xff] }
  0x14   : > { %v1325_v44 = vld [vmem:[%s1443_s6 + $0x34] sm:$0xff]   ;;  %v1326_v46 = vld [vmem:[%s1443_s6 + $0x3c] sm:$0xff]  ;;  %v1257_v50 = vld [vmem:[%s1443_s6 + $0x8] sm:$0xff]  }
  0x15   : > { %v1206_v48 = vld [vmem:[%s1443_s6] sm:$0xff]   ;;  %v1196_v49 = vld [vmem:[%s1443_s6 + $0x10] sm:$0xff]  ;;  %v1197_v51 = vld [vmem:[%s1443_s6 + $0x18] sm:$0xff] }
  0x16   : > { %327 = vmatpush.bf16.msra.mxu0 %v1084_v19  ;;  %1308 = vmatpush.bf16.msra.mxu2 %v1084_v19  ;;  %v1258_v52 = vld [vmem:[%s1443_s6 + $0x10] sm:$0xff]   ;;  %v1198_v53 = vld [vmem:[%s1443_s6 + $0x20] sm:$0xff]  ;;  %v1259_v54 = vld [vmem:[%s1443_s6 + $0x18] sm:$0xff]  }
  0x17   : > { %376 = vmatpush.bf16.msra.mxu1 %v1088_v20  ;;  %1310 = vmatpush.bf16.msra.mxu3 %v1088_v20  ;;  %v1199_v55 = vld [vmem:[%s1443_s6 + $0x28] sm:$0xff]  ;;  %v1260_v57 = vld [vmem:[%s1443_s6 + $0x20] sm:$0xff]   ;;  %v1200_v1 = vld [vmem:[%s1443_s6 + $0x30] sm:$0xff] }
  0x18   : > { %v1261_v3 = vld [vmem:[%s1443_s6 + $0x28] sm:$0xff]   ;;  %v1201_v11 = vld [vmem:[%s1443_s6 + $0x38] sm:$0xff]  ;;  %v1262_v13 = vld [vmem:[%s1443_s6 + $0x30] sm:$0xff]  }
  0x19   : > { %1089 = vmatmul.msk.bf16.vlgmr.msra.gmra.mxu0 %vm288_vm1, %v1313_v23  ;;  %1093 = vmatmul.msk.bf16.vlgmr.msra.gmra.mxu2 %vm288_vm1, %v1321_v24  ;;  %v1202_v21 = vld [vmem:[%s1443_s6 + $0x40] sm:$0xff] }
  0x1a   : > { %479 = vmatpush.bf16.msrb.mxu2 %v468_v25  ;;  %1097 = vmatmul.msk.bf16.vlgmr.msra.gmra.mxu1 %vm288_vm1, %v1313_v23  ;;  %v1263_v23 = vld [vmem:[%s1443_s6 + $0x38] sm:$0xff]   ;;  %v806_v33 = vld [vmem:[%s1697_s2] sm:$0x3] }
  0x1b   : > { %528 = vmatpush.bf16.msrb.mxu3 %v471_v26  ;;  %682 = vmatpush.bf16.msrb.mxu0 %v671_v27  ;;  %v1610_v39 = vperm.slane %v806_v33, 1 }
  0x1c   : > { %1101 = vmatmul.msk.bf16.vlgmr.msra.gmra.mxu3 %vm288_vm1, %v1321_v24  ;;  %731 = vmatpush.bf16.msrb.mxu1 %v674_v28 }
  0x1e   : > { %480 = vmatpush.bf16.msrb.mxu2 %v1108_v32 }
  0x1f   : > { %529 = vmatpush.bf16.msrb.mxu3 %v1112_v36  ;;  %683 = vmatpush.bf16.msrb.mxu0 %v1167_v37  ;;  %v1608_v36 = vperm.slane %v806_v33, 0 }
  0x20   : > { %732 = vmatpush.bf16.msrb.mxu1 %v1171_v40 }
  0x29   : > { %1090 = vmatmul.msk.bf16.gmra.mxu0 %vm288_vm1, %v1315_v41  ;;  %1094 = vmatmul.msk.bf16.gmra.mxu2 %vm288_vm1, %v1323_v42 }
  0x2a   : > { %1098 = vmatmul.msk.bf16.gmra.mxu1 %vm288_vm1, %v1315_v41 }
  0x2c   : > { %1102 = vmatmul.msk.bf16.gmra.mxu3 %vm288_vm1, %v1323_v42 }
  0x39   : > { %1091 = vmatmul.msk.bf16.gmra.mxu0 %vm288_vm1, %v1317_v43  ;;  %1095 = vmatmul.msk.bf16.gmra.mxu2 %vm288_vm1, %v1325_v44 }
  0x3a   : > { %1099 = vmatmul.msk.bf16.gmra.mxu1 %vm288_vm1, %v1317_v43 }
  0x3c   : > { %1103 = vmatmul.msk.bf16.gmra.mxu3 %vm288_vm1, %v1325_v44 }
  0x49   : > { %1092 = vmatmul.msk.bf16.gmra.mxu0 %vm288_vm1, %v1319_v45  ;;  %1096 = vmatmul.msk.bf16.gmra.mxu2 %vm288_vm1, %v1326_v46 }
  0x4a   : > { %1100 = vmatmul.msk.bf16.gmra.mxu1 %vm288_vm1, %v1319_v45 }
  0x4c   : > { %1104 = vmatmul.msk.bf16.gmra.mxu3 %vm288_vm1, %v1326_v46 }
  0x59   : > { %1113 = vmatmul.msk.bf16.vlgmr.msrb.gmra.mxu2 %vm288_vm1, %v1206_v48  ;;  %1172 = vmatmul.msk.bf16.vlgmr.msrb.gmra.mxu0 %vm288_vm1, %v1195_v47 }
  0x5a   : > { %1180 = vmatmul.msk.bf16.vlgmr.msrb.gmra.mxu1 %vm288_vm1, %v1195_v47 }
  0x5c   : > { %1121 = vmatmul.msk.bf16.vlgmr.msrb.gmra.mxu3 %vm288_vm1, %v1206_v48 }
  0x69   : > { %1114 = vmatmul.msk.bf16.gmra.mxu2 %vm288_vm1, %v1257_v50  ;;  %1173 = vmatmul.msk.bf16.gmra.mxu0 %vm288_vm1, %v1196_v49 }
  0x6a   : > { %1181 = vmatmul.msk.bf16.gmra.mxu1 %vm288_vm1, %v1196_v49 }
  0x6c   : > { %1122 = vmatmul.msk.bf16.gmra.mxu3 %vm288_vm1, %v1257_v50 }
  0x79   : > { %1115 = vmatmul.msk.bf16.gmra.mxu2 %vm288_vm1, %v1258_v52  ;;  %1174 = vmatmul.msk.bf16.gmra.mxu0 %vm288_vm1, %v1197_v51 }
  0x7a   : > { %1182 = vmatmul.msk.bf16.gmra.mxu1 %vm288_vm1, %v1197_v51 }
  0x7c   : > { %1123 = vmatmul.msk.bf16.gmra.mxu3 %vm288_vm1, %v1258_v52 }
  0x89   : > { %1116 = vmatmul.msk.bf16.gmra.mxu2 %vm288_vm1, %v1259_v54  ;;  %1175 = vmatmul.msk.bf16.gmra.mxu0 %vm288_vm1, %v1198_v53 }
  0x8a   : > { %1183 = vmatmul.msk.bf16.gmra.mxu1 %vm288_vm1, %v1198_v53 }
  0x8c   : > { %1124 = vmatmul.msk.bf16.gmra.mxu3 %vm288_vm1, %v1259_v54 }
  0x96   : > { %v329_v56 = vpop.f32.mrf.mxu0 }
  0x97   : > { %v378_v58 = vpop.f32.mrf.mxu1 }
  0x99   : > { %1117 = vmatmul.msk.bf16.gmra.mxu2 %vm288_vm1, %v1260_v57  ;;  %1176 = vmatmul.msk.bf16.gmra.mxu0 %vm288_vm1, %v1199_v55 }
  0x9a   : > { %1184 = vmatmul.msk.bf16.gmra.mxu1 %vm288_vm1, %v1199_v55 }
  0x9c   : > { %1125 = vmatmul.msk.bf16.gmra.mxu3 %vm288_vm1, %v1260_v57  ;;  %v1527_v59 = vpop.f32.mrf.mxu2 }
  0x9e   : > { %v1531_v61 = vpop.f32.mrf.mxu0 }
  0x9f   : > { %v1529_v60 = vpop.f32.mrf.mxu3  ;;  %v1533_v62 = vpop.f32.mrf.mxu1 }
  0xa4   : > { %v1535_v63 = vpop.f32.mrf.mxu2 }
  0xa6   : > { %v1540_v2 = vpop.f32.mrf.mxu0 }
  0xa7   : > { %v1537_v0 = vpop.f32.mrf.mxu3  ;;  %v1543_v4 = vpop.f32.mrf.mxu1 }
  0xa9   : > { %1118 = vmatmul.msk.bf16.gmra.mxu2 %vm288_vm1, %v1261_v3  ;;  %1177 = vmatmul.msk.bf16.gmra.mxu0 %vm288_vm1, %v1200_v1 }
  0xaa   : > { %1185 = vmatmul.msk.bf16.gmra.mxu1 %vm288_vm1, %v1200_v1 }
  0xac   : > { %1126 = vmatmul.msk.bf16.gmra.mxu3 %vm288_vm1, %v1261_v3  ;;  %v1549_v5 = vpop.f32.mrf.mxu2 }
  0xae   : > { %v1553_v7 = vpop.f32.mrf.mxu0 }
  0xaf   : > { %v1551_v6 = vpop.f32.mrf.mxu3  ;;  %v1555_v8 = vpop.f32.mrf.mxu1 }
  0xb4   : > { %v1557_v9 = vpop.f32.mrf.mxu2 }
  0xb6   : > { %v1562_v12 = vpop.f32.mrf.mxu0 }
  0xb7   : > { %v1559_v10 = vpop.f32.mrf.mxu3  ;;  %v1565_v14 = vpop.f32.mrf.mxu1 }
  0xb9   : > { %1119 = vmatmul.msk.bf16.gmra.mxu2 %vm288_vm1, %v1262_v13  ;;  %1178 = vmatmul.msk.bf16.gmra.mxu0 %vm288_vm1, %v1201_v11 }
  0xba   : > { %1186 = vmatmul.msk.bf16.gmra.mxu1 %vm288_vm1, %v1201_v11 }
  0xbc   : > { %1127 = vmatmul.msk.bf16.gmra.mxu3 %vm288_vm1, %v1262_v13  ;;  %v1571_v15 = vpop.f32.mrf.mxu2 }
  0xbe   : > { %v1575_v17 = vpop.f32.mrf.mxu0 }
  0xbf   : > { %v1573_v16 = vpop.f32.mrf.mxu3  ;;  %v1577_v18 = vpop.f32.mrf.mxu1 }
  0xc4   : > { %v1579_v19 = vpop.f32.mrf.mxu2 }
  0xc6   : > { %v1584_v22 = vpop.f32.mrf.mxu0 }
  0xc7   : > { %v1581_v20 = vpop.f32.mrf.mxu3  ;;  %v1587_v24 = vpop.f32.mrf.mxu1 }
  0xc9   : > { %1120 = vmatmul.msk.bf16.gmra.mxu2 %vm288_vm1, %v1263_v23  ;;  %1179 = vmatmul.msk.bf16.gmra.mxu0 %vm288_vm1, %v1202_v21 }
  0xca   : > { %1187 = vmatmul.msk.bf16.gmra.mxu1 %vm288_vm1, %v1202_v21 }
  0xcc   : > { %1128 = vmatmul.msk.bf16.gmra.mxu3 %vm288_vm1, %v1263_v23  ;;  %v1593_v25 = vpop.f32.mrf.mxu2 }
  0xce   : > { %v1597_v27 = vpop.f32.mrf.mxu0 }
  0xcf   : > { %v1595_v26 = vpop.f32.mrf.mxu3  ;;  %v1599_v28 = vpop.f32.mrf.mxu1 }
  0xd4   : > { %v1601_v29 = vpop.f32.mrf.mxu2 }
  0xd6   : > { %v685_v31 = vpop.f32.mrf.mxu0 }
  0xd7   : > { %v1603_v30 = vpop.f32.mrf.mxu3  ;;  %v734_v32 = vpop.f32.mrf.mxu1 }
  0xdc   : > { %v482_v34 = vpop.f32.mrf.mxu2 }
  0xdd   : > { %v483_v35 = vadd.f32 %v482_v34, %v329_v56 }
  0xde   : > { %v687_v40 = vpop.f32.mrf.mxu0 }
  0xdf   : > { %v531_v37 = vpop.f32.mrf.mxu3  ;;  %v774_v41 = vadd.f32 %v685_v31, %v483_v35  ;;  %v736_v42 = vpop.f32.mrf.mxu1 }
  0xe0   : > { %v532_v38 = vadd.f32 %v531_v37, %v378_v58 }
  0xe1   : > { %v812_v44 = vadd.f32 %v1608_v36, %v774_v41 }
  0xe2   : > { %v775_v43 = vadd.f32 %v734_v32, %v532_v38 }
  0xe3   : > { %vm844_vm2 = vcmp.gt.f32.partialorder %v812_v44, 0.0  ;;  %v876_v46 = vmul.f32 0.01, %v812_v44 }
  0xe4   : > { %v813_v45 = vadd.f32 %v1610_v39, %v775_v43  ;;  %v484_v48 = vpop.f32.mrf.mxu2 }
  0xe5   : > { %v908_v49 = vsel %vm844_vm2, %v812_v44, %v876_v46  ;;  %v485_v50 = vadd.f32 %v484_v48, %v1531_v61 }
  0xe6   : > { %vm845_vm3 = vcmp.gt.f32.partialorder %v813_v45, 0.0  ;;  %v877_v47 = vmul.f32 0.01, %v813_v45  ;;  %v690_v54 = vpop.f32.mrf.mxu0 }
  0xe7   : > { %v533_v51 = vpop.f32.mrf.mxu3  ;;  %v776_v56 = vadd.f32 %v687_v40, %v485_v50  ;;  %v739_v57 = vpop.f32.mrf.mxu1 }
  0xe8   : > { %v909_v52 = vsel %vm845_vm3, %v813_v45, %v877_v47  ;;  %v534_v53 = vadd.f32 %v533_v51, %v1533_v62 }
  0xe9   : > { %v940_v55 = vmax.f32 %v908_v49, %v909_v52  ;;  %v814_v1 = vadd.f32 %v1608_v36, %v776_v56 }
  0xea   : > { %v777_v58 = vadd.f32 %v736_v42, %v534_v53 }
  0xeb   : > { %vm846_vm4 = vcmp.gt.f32.partialorder %v814_v1, 0.0  ;;  %v878_v11 = vmul.f32 0.01, %v814_v1 }
  0xec   : > { %v815_v3 = vadd.f32 %v1610_v39, %v777_v58  ;;  %v487_v21 = vpop.f32.mrf.mxu2 }
  0xed   : > { %v910_v23 = vsel %vm846_vm4, %v814_v1, %v878_v11  ;;  %v488_v61 = vadd.f32 %v487_v21, %v1540_v2 }
  0xee   : > { %vm847_vm5 = vcmp.gt.f32.partialorder %v815_v3, 0.0  ;;  %v879_v13 = vmul.f32 0.01, %v815_v3  ;;  %v692_v33 = vpop.f32.mrf.mxu0 }
  0xef   : > { %v536_v31 = vpop.f32.mrf.mxu3  ;;  %v778_v35 = vadd.f32 %v690_v54, %v488_v61  ;;  %v741_v37 = vpop.f32.mrf.mxu1 }
  0xf0   : > { %v911_v32 = vsel %vm847_vm5, %v815_v3, %v879_v13  ;;  %v537_v62 = vadd.f32 %v536_v31, %v1543_v4 }
  0xf1   : > { %v941_v34 = vmax.f32 %v910_v23, %v911_v32  ;;  %v816_v41 = vadd.f32 %v1608_v36, %v778_v35 }
  0xf2   : > { %v779_v38 = vadd.f32 %v739_v57, %v537_v62 }
  0xf3   : > { %v956_v40 = vmax.f32 %v940_v55, %v941_v34  ;;  %vm848_vm6 = vcmp.gt.f32.partialorder %v816_v41, 0.0  ;;  %v880_v43 = vmul.f32 0.01, %v816_v41 }
  0xf4   : > { %v817_v42 = vadd.f32 %v1610_v39, %v779_v38  ;;  %v489_v45 = vpop.f32.mrf.mxu2 }
  0xf5   : > { %v912_v2 = vsel %vm848_vm6, %v816_v41, %v880_v43  ;;  %v490_v46 = vadd.f32 %v489_v45, %v1553_v7 }
  0xf6   : > { %vm849_vm7 = vcmp.gt.f32.partialorder %v817_v42, 0.0  ;;  %v881_v44 = vmul.f32 0.01, %v817_v42  ;;  %v695_v49 = vpop.f32.mrf.mxu0 }
  0xf7   : > { %v538_v47 = vpop.f32.mrf.mxu3  ;;  %v780_v51 = vadd.f32 %v692_v33, %v490_v46  ;;  %v744_v52 = vpop.f32.mrf.mxu1 }
  0xf8   : > { %v913_v4 = vsel %vm849_vm7, %v817_v42, %v881_v44  ;;  %v539_v48 = vadd.f32 %v538_v47, %v1555_v8 }
  0xf9   : > { %v942_v50 = vmax.f32 %v912_v2, %v913_v4  ;;  %v818_v54 = vadd.f32 %v1608_v36, %v780_v51 }
  0xfa   : > { %v781_v53 = vadd.f32 %v741_v37, %v539_v48 }
  0xfb   : > { %vm850_vm8 = vcmp.gt.f32.partialorder %v818_v54, 0.0  ;;  %v882_v56 = vmul.f32 0.01, %v818_v54 }
  0xfc   : > { %v819_v55 = vadd.f32 %v1610_v39, %v781_v53  ;;  %v492_v58 = vpop.f32.mrf.mxu2 }
  0xfd   : > { %v914_v7 = vsel %vm850_vm8, %v818_v54, %v882_v56  ;;  %v493_v1 = vadd.f32 %v492_v58, %v1562_v12 }
  0xfe   : > { %vm851_vm9 = vcmp.gt.f32.partialorder %v819_v55, 0.0  ;;  %v883_v57 = vmul.f32 0.01, %v819_v55  ;;  %v697_v13 = vpop.f32.mrf.mxu0 }
  0xff   : > { %v541_v3 = vpop.f32.mrf.mxu3  ;;  %v782_v23 = vadd.f32 %v695_v49, %v493_v1  ;;  %v746_v61 = vpop.f32.mrf.mxu1 }
 0x100   : > { %v915_v8 = vsel %vm851_vm9, %v819_v55, %v883_v57  ;;  %v542_v11 = vadd.f32 %v541_v3, %v1565_v14 }
 0x101   : > { %v943_v21 = vmax.f32 %v914_v7, %v915_v8  ;;  %v820_v62 = vadd.f32 %v1608_v36, %v782_v23 }
 0x102   : > { %v783_v31 = vadd.f32 %v744_v52, %v542_v11 }
 0x103   : > { %v957_v32 = vmax.f32 %v942_v50, %v943_v21  ;;  %vm852_vm10 = vcmp.gt.f32.partialorder %v820_v62, 0.0  ;;  %v884_v14 = vmul.f32 0.01, %v820_v62 }
 0x104   : > { %v821_v12 = vadd.f32 %v1610_v39, %v783_v31  ;;  %v494_v35 = vpop.f32.mrf.mxu2 }
 0x105   : > { %v1240_v33 = vpack.c.bf16 %v957_v32, %v956_v40  ;;  %v916_v37 = vsel %vm852_vm10, %v820_v62, %v884_v14  ;;  %v495_v38 = vadd.f32 %v494_v35, %v1575_v17 }
 0x106   : > { %vm853_vm11 = vcmp.gt.f32.partialorder %v821_v12, 0.0  ;;  %v885_v34 = vmul.f32 0.01, %v821_v12  ;;  %v700_v44 = vpop.f32.mrf.mxu0 }
 0x107   : > { %1241 = vst [vmem:[%s1633_s5] sm:$0xff] %v1240_v33   ;;  %v543_v41 = vpop.f32.mrf.mxu3  ;;  %v784_v2 = vadd.f32 %v697_v13, %v495_v38  ;;  %v749_v46 = vpop.f32.mrf.mxu1 }
 0x108   : > { %v917_v42 = vsel %vm853_vm11, %v821_v12, %v885_v34  ;;  %v544_v43 = vadd.f32 %v543_v41, %v1577_v18 }
 0x109   : > { %v944_v45 = vmax.f32 %v916_v37, %v917_v42  ;;  %v822_v40 = vadd.f32 %v1608_v36, %v784_v2 }
 0x10a   : > { %v785_v47 = vadd.f32 %v746_v61, %v544_v43 }
 0x10b   : > { %vm854_vm12 = vcmp.gt.f32.partialorder %v822_v40, 0.0  ;;  %v886_v48 = vmul.f32 0.01, %v822_v40 }
 0x10c   : > { %v823_v4 = vadd.f32 %v1610_v39, %v785_v47  ;;  %v497_v50 = vpop.f32.mrf.mxu2 }
 0x10d   : > { %v918_v51 = vsel %vm854_vm12, %v822_v40, %v886_v48  ;;  %v498_v17 = vadd.f32 %v497_v50, %v1584_v22 }
 0x10e   : > { %vm855_vm13 = vcmp.gt.f32.partialorder %v823_v4, 0.0  ;;  %v887_v49 = vmul.f32 0.01, %v823_v4  ;;  %v702_v54 = vpop.f32.mrf.mxu0 }
 0x10f   : > { %v546_v52 = vpop.f32.mrf.mxu3  ;;  %v786_v56 = vadd.f32 %v700_v44, %v498_v17  ;;  %v751_v57 = vpop.f32.mrf.mxu1 }
 0x110   : > { %v919_v53 = vsel %vm855_vm13, %v823_v4, %v887_v49  ;;  %v547_v18 = vadd.f32 %v546_v52, %v1587_v24 }
 0x111   : > { %v945_v55 = vmax.f32 %v918_v51, %v919_v53  ;;  %v824_v1 = vadd.f32 %v1608_v36, %v786_v56 }
 0x112   : > { %v787_v58 = vadd.f32 %v749_v46, %v547_v18 }
 0x113   : > { %v958_v7 = vmax.f32 %v944_v45, %v945_v55  ;;  %vm856_vm14 = vcmp.gt.f32.partialorder %v824_v1, 0.0  ;;  %v888_v8 = vmul.f32 0.01, %v824_v1 }
 0x114   : > { %v825_v3 = vadd.f32 %v1610_v39, %v787_v58  ;;  %v499_v13 = vpop.f32.mrf.mxu2 }
 0x115   : > { %v920_v22 = vsel %vm856_vm14, %v824_v1, %v888_v8  ;;  %v500_v21 = vadd.f32 %v499_v13, %v1597_v27 }
 0x116   : > { %vm857_vm15 = vcmp.gt.f32.partialorder %v825_v3, 0.0  ;;  %v889_v11 = vmul.f32 0.01, %v825_v3  ;;  %v705_v31 = vpop.f32.mrf.mxu0 }
 0x117   : > { %v548_v23 = vpop.f32.mrf.mxu3  ;;  %v788_v62 = vadd.f32 %v702_v54, %v500_v21  ;;  %v754_v12 = vpop.f32.mrf.mxu1 }
 0x118   : > { %v921_v24 = vsel %vm857_vm15, %v825_v3, %v889_v11  ;;  %v549_v61 = vadd.f32 %v548_v23, %v1599_v28 }
 0x119   : > { %v946_v32 = vmax.f32 %v920_v22, %v921_v24  ;;  %v826_v14 = vadd.f32 %v1608_v36, %v788_v62 }
 0x11a   : > { %v789_v33 = vadd.f32 %v751_v57, %v549_v61 }
 0x11b   : > { %vm858_vm0 = vcmp.gt.f32.partialorder %v826_v14, 0.0  ;;  %v890_v35 = vmul.f32 0.01, %v826_v14 }
 0x11c   : > { %v827_v34 = vadd.f32 %v1610_v39, %v789_v33  ;;  %v502_v38 = vpop.f32.mrf.mxu2 }
 0x11d   : > { %v922_v27 = vsel %vm858_vm0, %v826_v14, %v890_v35  ;;  %v503_v48 = vadd.f32 %v502_v38, %v1527_v59 }
 0x11e   : > { %vm859_vm1 = vcmp.gt.f32.partialorder %v827_v34, 0.0  ;;  %v891_v37 = vmul.f32 0.01, %v827_v34  ;;  %v707_v43 = vpop.f32.mrf.mxu0 }
 0x11f   : > { %v551_v41 = vpop.f32.mrf.mxu3  ;;  %v756_v44 = vpop.f32.mrf.mxu1  ;;  %v790_v52 = vadd.f32 %v705_v31, %v503_v48 }
 0x120   : > { %v923_v42 = vsel %vm859_vm1, %v827_v34, %v891_v37  ;;  %v552_v51 = vadd.f32 %v551_v41, %v1529_v60 }
 0x121   : > { %v947_v28 = vmax.f32 %v922_v27, %v923_v42 }
 0x122   : > { %v791_v58 = vadd.f32 %v754_v12, %v552_v51 }
 0x123   : > { %v959_v45 = vmax.f32 %v946_v32, %v947_v28 }
 0x124   : > { %v504_v46 = vpop.f32.mrf.mxu2  ;;  %v829_v3 = vadd.f32 %v1610_v39, %v791_v58 }
 0x125   : > { %v1245_v2 = vpack.c.bf16 %v959_v45, %v958_v7  ;;  %v505_v49 = vadd.f32 %v504_v46, %v1535_v63  ;;  %v828_v63 = vadd.f32 %v1608_v36, %v790_v52 }
 0x126   : > { %v710_v40 = vpop.f32.mrf.mxu0  ;;  %v893_v61 = vmul.f32 0.01, %v829_v3  ;;  %vm861_vm5 = vcmp.gt.f32.partialorder %v829_v3, 0.0 }
 0x127   : > { %1264 = vst [vmem:[%s1633_s5 + $0x8] sm:$0xff] %v1245_v2   ;;  %v553_v47 = vpop.f32.mrf.mxu3  ;;  %v759_v4 = vpop.f32.mrf.mxu1  ;;  %v792_v54 = vadd.f32 %v707_v43, %v505_v49  ;;  %vm860_vm2 = vcmp.gt.f32.partialorder %v828_v63, 0.0  ;;  %v892_v22 = vmul.f32 0.01, %v828_v63 }
 0x128   : > { %v554_v50 = vadd.f32 %v553_v47, %v1537_v0  ;;  %v925_v38 = vsel %vm861_vm5, %v829_v3, %v893_v61 }
 0x129   : > { %v830_v0 = vadd.f32 %v1608_v36, %v792_v54 }
 0x12a   : > { %v793_v55 = vadd.f32 %v756_v44, %v554_v50 }
 0x12b   : > { %v894_v21 = vmul.f32 0.01, %v830_v0  ;;  %vm862_vm3 = vcmp.gt.f32.partialorder %v830_v0, 0.0 }
 0x12c   : > { %v507_v17 = vpop.f32.mrf.mxu2  ;;  %v831_v60 = vadd.f32 %v1610_v39, %v793_v55 }
 0x12d   : > { %v508_v53 = vadd.f32 %v507_v17, %v1549_v5  ;;  %v926_v34 = vsel %vm862_vm3, %v830_v0, %v894_v21 }
 0x12e   : > { %v712_v57 = vpop.f32.mrf.mxu0  ;;  %v895_v23 = vmul.f32 0.01, %v831_v60  ;;  %vm863_vm4 = vcmp.gt.f32.partialorder %v831_v60, 0.0 }
 0x12f   : > { %v556_v18 = vpop.f32.mrf.mxu3  ;;  %v761_v7 = vpop.f32.mrf.mxu1  ;;  %v794_v1 = vadd.f32 %v710_v40, %v508_v53 }
 0x130   : > { %v557_v56 = vadd.f32 %v556_v18, %v1551_v6  ;;  %v927_v35 = vsel %vm863_vm4, %v831_v60, %v895_v23 }
 0x131   : > { %v832_v5 = vadd.f32 %v1608_v36, %v794_v1  ;;  %v949_v44 = vmax.f32 %v926_v34, %v927_v35 }
 0x132   : > { %v795_v59 = vadd.f32 %v759_v4, %v557_v56 }
 0x133   : > { %v896_v32 = vmul.f32 0.01, %v832_v5  ;;  %vm864_vm6 = vcmp.gt.f32.partialorder %v832_v5, 0.0 }
 0x134   : > { %v833_v8 = vadd.f32 %v1610_v39, %v795_v59  ;;  %v509_v11 = vpop.f32.mrf.mxu2 }
 0x135   : > { %v510_v6 = vadd.f32 %v509_v11, %v1557_v9  ;;  %v928_v41 = vsel %vm864_vm6, %v832_v5, %v896_v32 }
 0x136   : > { %v897_v62 = vmul.f32 0.01, %v833_v8  ;;  %v715_v33 = vpop.f32.mrf.mxu0  ;;  %vm865_vm7 = vcmp.gt.f32.partialorder %v833_v8, 0.0 }
 0x137   : > { %v558_v13 = vpop.f32.mrf.mxu3  ;;  %v796_v31 = vadd.f32 %v712_v57, %v510_v6  ;;  %v764_v9 = vpop.f32.mrf.mxu1 }
 0x138   : > { %v559_v24 = vadd.f32 %v558_v13, %v1559_v10  ;;  %v924_v10 = vsel %vm860_vm2, %v828_v63, %v892_v22  ;;  %v929_v42 = vsel %vm865_vm7, %v833_v8, %v897_v62 }
 0x139   : > { %v834_v14 = vadd.f32 %v1608_v36, %v796_v31  ;;  %v948_v47 = vmax.f32 %v924_v10, %v925_v38  ;;  %v950_v40 = vmax.f32 %v928_v41, %v929_v42 }
 0x13a   : > { %v797_v12 = vadd.f32 %v761_v7, %v559_v24 }
 0x13b   : > { %vm866_vm8 = vcmp.gt.f32.partialorder %v834_v14, 0.0  ;;  %v898_v27 = vmul.f32 0.01, %v834_v14  ;;  %v960_v48 = vmax.f32 %v948_v47, %v949_v44 }
 0x13c   : > { %v835_v37 = vadd.f32 %v1610_v39, %v797_v12  ;;  %v512_v28 = vpop.f32.mrf.mxu2 }
 0x13d   : > { %v930_v45 = vsel %vm866_vm8, %v834_v14, %v898_v27  ;;  %v513_v18 = vadd.f32 %v512_v28, %v1571_v15 }
 0x13e   : > { %vm867_vm9 = vcmp.gt.f32.partialorder %v835_v37, 0.0  ;;  %v899_v43 = vmul.f32 0.01, %v835_v37  ;;  %v717_v50 = vpop.f32.mrf.mxu0 }
 0x13f   : > { %v561_v2 = vpop.f32.mrf.mxu3  ;;  %v766_v17 = vpop.f32.mrf.mxu1  ;;  %v798_v7 = vadd.f32 %v715_v33, %v513_v18 }
 0x140   : > { %v931_v46 = vsel %vm867_vm9, %v835_v37, %v899_v43  ;;  %v562_v56 = vadd.f32 %v561_v2, %v1573_v16 }
 0x141   : > { %v951_v4 = vmax.f32 %v930_v45, %v931_v46 }
 0x142   : > { %v799_v5 = vadd.f32 %v764_v9, %v562_v56 }
 0x143   : > { %v961_v49 = vmax.f32 %v950_v40, %v951_v4 }
 0x144   : > { %v514_v52 = vpop.f32.mrf.mxu2  ;;  %v837_v11 = vadd.f32 %v1610_v39, %v799_v5 }
 0x145   : > { %v1250_v51 = vpack.c.bf16 %v961_v49, %v960_v48  ;;  %v515_v54 = vadd.f32 %v514_v52, %v1579_v19  ;;  %v836_v19 = vadd.f32 %v1608_v36, %v798_v7 }
 0x146   : > { %v720_v57 = vpop.f32.mrf.mxu0  ;;  %v901_v32 = vmul.f32 0.01, %v837_v11  ;;  %vm869_vm13 = vcmp.gt.f32.partialorder %v837_v11, 0.0 }
 0x147   : > { %1265 = vst [vmem:[%s1633_s5 + $0x10] sm:$0xff] %v1250_v51   ;;  %v563_v53 = vpop.f32.mrf.mxu3  ;;  %v769_v1 = vpop.f32.mrf.mxu1  ;;  %v800_v0 = vadd.f32 %v717_v50, %v515_v54  ;;  %vm868_vm10 = vcmp.gt.f32.partialorder %v836_v19, 0.0  ;;  %v900_v21 = vmul.f32 0.01, %v836_v19 }
 0x148   : > { %v564_v55 = vadd.f32 %v563_v53, %v1581_v20 }
 0x149   : > { %v838_v20 = vadd.f32 %v1608_v36, %v800_v0  ;;  %v932_v10 = vsel %vm868_vm10, %v836_v19, %v900_v21 }
 0x14a   : > { %v801_v60 = vadd.f32 %v766_v17, %v564_v55 }
 0x14b   : > { %v902_v23 = vmul.f32 0.01, %v838_v20  ;;  %vm870_vm11 = vcmp.gt.f32.partialorder %v838_v20, 0.0 }
 0x14c   : > { %v517_v58 = vpop.f32.mrf.mxu2  ;;  %v839_v16 = vadd.f32 %v1610_v39, %v801_v60 }
 0x14d   : > { %v518_v59 = vadd.f32 %v517_v58, %v1593_v25  ;;  %v934_v34 = vsel %vm870_vm11, %v838_v20, %v902_v23 }
 0x14e   : > { %v903_v24 = vmul.f32 0.01, %v839_v16  ;;  %v722_v61 = vpop.f32.mrf.mxu0  ;;  %vm871_vm12 = vcmp.gt.f32.partialorder %v839_v16, 0.0 }
 0x14f   : > { %v566_v63 = vpop.f32.mrf.mxu3  ;;  %v802_v8 = vadd.f32 %v720_v57, %v518_v59  ;;  %v771_v62 = vpop.f32.mrf.mxu1 }
 0x150   : > { %v567_v3 = vadd.f32 %v566_v63, %v1595_v26  ;;  %v935_v35 = vsel %vm871_vm12, %v839_v16, %v903_v24 }
 0x151   : > { %v840_v6 = vadd.f32 %v1608_v36, %v802_v8  ;;  %v953_v43 = vmax.f32 %v934_v34, %v935_v35 }
 0x152   : > { %v803_v15 = vadd.f32 %v769_v1, %v567_v3 }
 0x153   : > { %v904_v33 = vmul.f32 0.01, %v840_v6  ;;  %vm872_vm14 = vcmp.gt.f32.partialorder %v840_v6, 0.0 }
 0x154   : > { %v841_v25 = vadd.f32 %v1610_v39, %v803_v15  ;;  %v519_v13 = vpop.f32.mrf.mxu2 }
 0x155   : > { %v520_v22 = vadd.f32 %v519_v13, %v1601_v29  ;;  %v936_v27 = vsel %vm872_vm14, %v840_v6, %v904_v33 }
 0x156   : > { %v905_v14 = vmul.f32 0.01, %v841_v25  ;;  %vm873_vm15 = vcmp.gt.f32.partialorder %v841_v25, 0.0 }
 0x157   : > { %v568_v26 = vpop.f32.mrf.mxu3  ;;  %v804_v12 = vadd.f32 %v722_v61, %v520_v22 }
 0x158   : > { %v569_v31 = vadd.f32 %v568_v26, %v1603_v30  ;;  %v933_v30 = vsel %vm869_vm13, %v837_v11, %v901_v32  ;;  %v937_v41 = vsel %vm873_vm15, %v841_v25, %v905_v14 }
 0x159   : > { %v842_v29 = vadd.f32 %v1608_v36, %v804_v12  ;;  %v952_v45 = vmax.f32 %v932_v10, %v933_v30  ;;  %v954_v2 = vmax.f32 %v936_v27, %v937_v41 }
 0x15a   : > { %v805_v9 = vadd.f32 %v771_v62, %v569_v31 }
 0x15b   : > { %vm874_vm0 = vcmp.gt.f32.partialorder %v842_v29, 0.0  ;;  %v906_v38 = vmul.f32 0.01, %v842_v29  ;;  %v962_v46 = vmax.f32 %v952_v45, %v953_v43 }
 0x15c   : > { %v843_v37 = vadd.f32 %v1610_v39, %v805_v9 }
 0x15d   : > { %v938_v28 = vsel %vm874_vm0, %v842_v29, %v906_v38 }
 0x15e   : > { %vm875_vm1 = vcmp.gt.f32.partialorder %v843_v37, 0.0  ;;  %v907_v42 = vmul.f32 0.01, %v843_v37 }
 0x160   : > { %v939_v44 = vsel %vm875_vm1, %v843_v37, %v907_v42 }
 0x161   : > { %v955_v36 = vmax.f32 %v938_v28, %v939_v44 }
 0x163   : > { %v963_v47 = vmax.f32 %v954_v2, %v955_v36 }
 0x165   : > { %v1255_v40 = vpack.c.bf16 %v963_v47, %v962_v46 }
 0x167   : > { %1266 = vst [vmem:[%s1633_s5 + $0x18] sm:$0xff] %v1255_v40  }
 0x168 PF: > { %s13_s14 = sadd.s32 1, %s1374_s14   ;;  %s1699_s12 = smov %s1370_s13 }
 0x169   : > { %p10_p5 = scmp.ge.s32.totalorder %s13_s14, 4   ;;  %s1700_s13 = smov %s1702_s15 }
 0x16b   :  { %12 = sbr.rel (!%p10_p5) target bundleno = 2 (0x2), region = 64 }

</bundles_post_ra>
